<compile_context>
chip_gen: v5e
topology: v5e:2x2
jax: 0.10.0
libtpu: 0.0.40
codegen_flags: <defaults>
</compile_context>

<pallas_src>
import jax
import jax.numpy as jnp
from jax.experimental import pallas as pl
from jax.experimental.pallas import tpu as pltpu

BN_EPS = 1e-5
LANE = 128
SUBLANE = 8
VMEM_LIMIT_BYTES = 48 * 1024 * 1024     # <= physical VMEM on v5e/v6e/v7x
FUSED_VMEM_BUDGET = 12 * 1024 * 1024    # gate for the fully fused path


def _round_up(v, m):
    return (v + m - 1) // m * m


def _cdiv(a, b):
    return -(-a // b)


def _fused_forward(xp, w1p, gammap, betap, w2p, b2p, *, n, tn, num_tiles):
    """One pallas_call; fc1 activations live in a VMEM scratch (no HBM trip)."""
    n_pad, d = xp.shape
    hp = w1p.shape[1]
    op = w2p.shape[1]
    inv_n = 1.0 / n

    def kernel(x_ref, w1_ref, gamma_ref, beta_ref, w2_ref, b2_ref,
               out_ref, hidden_ref,
               u_ref, ssum_ref, ssq_ref, scale_ref, shift_ref):
        phase = pl.program_id(0)
        i = pl.program_id(1)
        row0 = pl.multiple_of(i * tn, SUBLANE)

        @pl.when(phase == 0)
        def _():
            # fc1 (bias folded out -- it cancels in train-mode BatchNorm).
            u = jnp.dot(x_ref[...], w1_ref[...],
                        preferred_element_type=jnp.float32)
            u_ref[pl.ds(row0, tn), :] = u

            @pl.when(i == 0)
            def _():
                ssum_ref[...] = jnp.zeros_like(ssum_ref)
                ssq_ref[...] = jnp.zeros_like(ssq_ref)

            # Zero-padded batch rows contribute exactly 0 here -> no masking.
            ssum_ref[...] += jnp.sum(u, axis=0, keepdims=True)
            ssq_ref[...] += jnp.sum(u * u, axis=0, keepdims=True)

            @pl.when(i == num_tiles - 1)
            def _():
                mean = ssum_ref[...] * inv_n
                var = jnp.maximum(ssq_ref[...] * inv_n - mean * mean, 0.0)
                sc = gamma_ref[...] * jax.lax.rsqrt(var + BN_EPS)
                scale_ref[...] = sc
                shift_ref[...] = beta_ref[...] - mean * sc

        @pl.when(phase == 1)
        def _():
            u = u_ref[pl.ds(row0, tn), :]
            hb = u * scale_ref[...] + shift_ref[...]
            # Numerically stable softplus (matches torch.nn.functional.softplus).
            hid = jnp.maximum(hb, 0.0) + jnp.log1p(jnp.exp(-jnp.abs(hb)))
            hidden_ref[...] = hid
            out_ref[...] = (jnp.dot(hid, w2_ref[...],
                                    preferred_element_type=jnp.float32)
                            + b2_ref[...])

    out_p, hidden_p = pl.pallas_call(
        kernel,
        out_shape=(
            jax.ShapeDtypeStruct((n_pad, op), jnp.float32),
            jax.ShapeDtypeStruct((n_pad, hp), jnp.float32),
        ),
        grid=(2, num_tiles),     # (phase, row tile); sequential dependencies
        in_specs=[
            # x is only needed in phase 0; park its index at block 0 in phase 1.
            pl.BlockSpec((tn, d), lambda p, i: (i * (1 - p), 0)),
            pl.BlockSpec((d, hp), lambda p, i: (0, 0)),
            pl.BlockSpec((1, hp), lambda p, i: (0, 0)),
            pl.BlockSpec((1, hp), lambda p, i: (0, 0)),
            pl.BlockSpec((hp, op), lambda p, i: (0, 0)),
            pl.BlockSpec((1, op), lambda p, i: (0, 0)),
        ],
        out_specs=(
            # Park outputs at block 0 during phase 0 so every output block is
            # written back exactly once, with phase-1 data.
            pl.BlockSpec((tn, op), lambda p, i: (i * p, 0)),
            pl.BlockSpec((tn, hp), lambda p, i: (i * p, 0)),
        ),
        scratch_shapes=[
            pltpu.VMEM((n_pad, hp), jnp.float32),   # resident fc1 activations
            pltpu.VMEM((1, hp), jnp.float32),       # running sum
            pltpu.VMEM((1, hp), jnp.float32),       # running sum of squares
            pltpu.VMEM((1, hp), jnp.float32),       # folded BN scale
            pltpu.VMEM((1, hp), jnp.float32),       # folded BN shift
        ],
        compiler_params=pltpu.CompilerParams(
            dimension_semantics=("arbitrary", "arbitrary"),
            vmem_limit_bytes=VMEM_LIMIT_BYTES),
    )(xp, w1p, gammap.reshape(1, hp), betap.reshape(1, hp), w2p,
      b2p.reshape(1, op))

    return out_p, hidden_p


def _two_pass_forward(xp, w1p, gammap, betap, w2p, b2p, *, n, tn, num_tiles):
    """Large-N path: kernel A emits per-tile BN partial stats only; kernel B
    recomputes fc1 and fuses BN + softplus + fc2 (no (N, Hp) HBM intermediate)."""
    n_pad, d = xp.shape
    hp = w1p.shape[1]
    op = w2p.shape[1]

    def stats_kernel(x_ref, w1_ref, stats_ref):
        u = jnp.dot(x_ref[...], w1_ref[...], preferred_element_type=jnp.float32)
        # Direct row stores -- no concat-with-zeros epilogue.
        stats_ref[0, 0:1, :] = jnp.sum(u, axis=0, keepdims=True)
        stats_ref[0, 1:2, :] = jnp.sum(u * u, axis=0, keepdims=True)

    stats = pl.pallas_call(
        stats_kernel,
        out_shape=jax.ShapeDtypeStruct((num_tiles, 2, hp), jnp.float32),
        grid=(num_tiles,),
        in_specs=[
            pl.BlockSpec((tn, d), lambda i: (i, 0)),
            pl.BlockSpec((d, hp), lambda i: (0, 0)),
        ],
        out_specs=pl.BlockSpec((1, 2, hp), lambda i: (i, 0, 0)),
        compiler_params=pltpu.CompilerParams(
            dimension_semantics=("parallel",),
            vmem_limit_bytes=VMEM_LIMIT_BYTES),
    )(xp, w1p)

    # Tiny JAX glue: fold train-mode BatchNorm into a single scale/shift.
    ssum = jnp.sum(stats[:, 0, :], axis=0)
    ssq = jnp.sum(stats[:, 1, :], axis=0)
    mean_u = ssum / n
    var = jnp.maximum(ssq / n - mean_u * mean_u, 0.0)   # biased var; b1 cancels
    scale1 = gammap * jax.lax.rsqrt(var + BN_EPS)
    shift1 = betap - mean_u * scale1
    scale = scale1.reshape(1, hp)
    shift = shift1.reshape(1, hp)

    def apply_kernel(x_ref, w1_ref, scale_ref, shift_ref, w2_ref, b2_ref,
                     out_ref, hidden_ref):
        u = jnp.dot(x_ref[...], w1_ref[...], preferred_element_type=jnp.float32)
        hb = u * scale_ref[...] + shift_ref[...]
        hid = jnp.maximum(hb, 0.0) + jnp.log1p(jnp.exp(-jnp.abs(hb)))
        hidden_ref[...] = hid
        out_ref[...] = (jnp.dot(hid, w2_ref[...],
                                preferred_element_type=jnp.float32)
                        + b2_ref[...])

    out_p, hidden_p = pl.pallas_call(
        apply_kernel,
        out_shape=(
            jax.ShapeDtypeStruct((n_pad, op), jnp.float32),
            jax.ShapeDtypeStruct((n_pad, hp), jnp.float32),
        ),
        grid=(num_tiles,),
        in_specs=[
            pl.BlockSpec((tn, d), lambda i: (i, 0)),
            pl.BlockSpec((d, hp), lambda i: (0, 0)),
            pl.BlockSpec((1, hp), lambda i: (0, 0)),
            pl.BlockSpec((1, hp), lambda i: (0, 0)),
            pl.BlockSpec((hp, op), lambda i: (0, 0)),
            pl.BlockSpec((1, op), lambda i: (0, 0)),
        ],
        out_specs=(
            pl.BlockSpec((tn, op), lambda i: (i, 0)),
            pl.BlockSpec((tn, hp), lambda i: (i, 0)),
        ),
        compiler_params=pltpu.CompilerParams(
            dimension_semantics=("parallel",),
            vmem_limit_bytes=VMEM_LIMIT_BYTES),
    )(xp, w1p, scale, shift, w2p, b2p.reshape(1, op))

    return out_p, hidden_p


def two_layer_nn(x, w1, b1, gamma, beta, w2, b2, *, row_tile=512,
                 force_two_pass=False):
    """x: (N, D) f32; w1 (D, H); w2 (H, O) (transposed vs. PyTorch Linear).
    Returns (out (N, O), hidden (N, H)) == TwoLayerNN.forward in train mode
    (BatchNorm1d uses batch statistics)."""
    del b1  # cancels exactly inside train-mode BatchNorm1d (see header note)
    n, d = x.shape
    h_dim = w1.shape[1]
    o_dim = w2.shape[1]

    hp = _round_up(h_dim, LANE)          # lane-dense hidden width
    op = _round_up(o_dim, LANE)          # lane-dense output width

    # Zero-pad parameters to lane-dense shapes.  Padded hidden columns produce
    # softplus(0)=log 2 (sliced off); padded w2 rows/cols are zero so `out` is
    # unaffected; padded out columns are zero (sliced off).
    w1p = jnp.pad(w1, ((0, 0), (0, hp - h_dim)))
    gammap = jnp.pad(gamma, (0, hp - h_dim))
    betap = jnp.pad(beta, (0, hp - h_dim))
    w2p = jnp.pad(w2, ((0, hp - h_dim), (0, op - o_dim)))
    b2p = jnp.pad(b2, (0, op - o_dim))

    # ---- choose path & row tiling -------------------------------------------
    # (On v6e/v5e with plenty of VMEM, row_tile=1024 is marginally better for
    #  the two-pass path; keep 512 as a safe default for v7x's 64 MiB VMEM.)
    tn_f = min(row_tile, _round_up(n, SUBLANE))
    num_tiles_f = _cdiv(n, tn_f)
    n_pad_f = tn_f * num_tiles_f
    fused_bytes = 4 * (n_pad_f * hp                 # resident fc1 scratch
                       + 2 * d * hp                 # w1 (double-buffered)
                       + 2 * hp * op                # w2
                       + 2 * tn_f * (d + hp + op)   # streaming tiles
                       + 8 * hp)                    # stats / scale / shift
    use_fused = (not force_two_pass) and fused_bytes <= FUSED_VMEM_BUDGET

    if use_fused:
        tn, num_tiles, n_pad = tn_f, num_tiles_f, n_pad_f
    else:
        # >= 2 tiles so the ("parallel",) grid axis can use both v7x TCs.
        num_tiles = max(2, _cdiv(n, row_tile))
        tn = _round_up(_cdiv(n, num_tiles), SUBLANE)
        n_pad = tn * num_tiles

    xp = jnp.pad(x, ((0, n_pad - n), (0, 0))) if n_pad != n else x

    if use_fused:
        out_p, hidden_p = _fused_forward(xp, w1p, gammap, betap, w2p, b2p,
                                         n=n, tn=tn, num_tiles=num_tiles)
    else:
        out_p, hidden_p = _two_pass_forward(xp, w1p, gammap, betap, w2p, b2p,
                                            n=n, tn=tn, num_tiles=num_tiles)

    return out_p[:n, :o_dim], hidden_p[:n, :h_dim]


if __name__ == "__main__":
    # Small shapes consistent with the module's forward: (n_data, input_dim).
    N, D, H, O = 8, 64, 10, 10

    key = jax.random.PRNGKey(0)
    kx, kw1, kb1, kw2, kb2 = jax.random.split(key, 5)

    x = jax.random.normal(kx, (N, D), dtype=jnp.float32)

    # PyTorch-Linear-style uniform init bounds (deterministic).
    bound1 = 1.0 / (D ** 0.5)
    w1 = jax.random.uniform(kw1, (D, H), minval=-bound1, maxval=bound1,
                            dtype=jnp.float32)
    b1 = jax.random.uniform(kb1, (H,), minval=-bound1, maxval=bound1,
                            dtype=jnp.float32)

    bound2 = 1.0 / (H ** 0.5)
    w2 = jax.random.uniform(kw2, (H, O), minval=-bound2, maxval=bound2,
                            dtype=jnp.float32)
    b2 = jax.random.uniform(kb2, (O,), minval=-bound2, maxval=bound2,
                            dtype=jnp.float32)

    # BatchNorm1d affine params at PyTorch defaults.
    gamma = jnp.ones((H,), dtype=jnp.float32)
    beta = jnp.zeros((H,), dtype=jnp.float32)

    fn = jax.jit(two_layer_nn,
                 static_argnames=("row_tile", "force_two_pass"))

    # Pure-JAX reference (same math as the PyTorch train-mode forward).
    h_ref = x @ w1 + b1
    mean = h_ref.mean(0, keepdims=True)
    var = ((h_ref - mean) ** 2).mean(0, keepdims=True)
    hidden_ref = jax.nn.softplus(
        (h_ref - mean) / jnp.sqrt(var + BN_EPS) * gamma + beta)
    out_ref = hidden_ref @ w2 + b2

    # Fused single-kernel path (small N).
    out, hidden = fn(x, w1, b1, gamma, beta, w2, b2)
    jax.block_until_ready((out, hidden))
    assert out.shape == (N, O) and hidden.shape == (N, H)
    assert jnp.allclose(hidden, hidden_ref, atol=1e-4, rtol=1e-4), \
        "hidden mismatch (fused)"
    assert jnp.allclose(out, out_ref, atol=1e-4, rtol=1e-4), \
        "output mismatch (fused)"

    # Large-N two-pass path (stats kernel + recompute/apply kernel).
    out2, hidden2 = fn(x, w1, b1, gamma, beta, w2, b2, force_two_pass=True)
    jax.block_until_ready((out2, hidden2))
    assert jnp.allclose(hidden2, hidden_ref, atol=1e-4, rtol=1e-4), \
        "hidden mismatch (two-pass)"
    assert jnp.allclose(out2, out_ref, atol=1e-4, rtol=1e-4), \
        "output mismatch (two-pass)"

    print("KERNEL_OK")
</pallas_src>

<mosaic_0001>
module attributes {stable_mosaic.version = 11 : i64} {
  func.func @kernel(%arg0: i32, %arg1: i32, %arg2: memref<8x64xf32, #tpu.memory_space<vmem>>, %arg3: memref<64x128xf32, #tpu.memory_space<vmem>>, %arg4: memref<1x128xf32, #tpu.memory_space<vmem>>, %arg5: memref<1x128xf32, #tpu.memory_space<vmem>>, %arg6: memref<128x128xf32, #tpu.memory_space<vmem>>, %arg7: memref<1x128xf32, #tpu.memory_space<vmem>>, %arg8: memref<8x128xf32, #tpu.memory_space<vmem>>, %arg9: memref<8x128xf32, #tpu.memory_space<vmem>>, %arg10: memref<8x128xf32, #tpu.memory_space<vmem>>, %arg11: memref<1x128xf32, #tpu.memory_space<vmem>>, %arg12: memref<1x128xf32, #tpu.memory_space<vmem>>, %arg13: memref<1x128xf32, #tpu.memory_space<vmem>>, %arg14: memref<1x128xf32, #tpu.memory_space<vmem>>) attributes {dimension_semantics = [#tpu.dimension_semantics<arbitrary>, #tpu.dimension_semantics<arbitrary>], iteration_bounds = array<i64: 2, 1>, scalar_prefetch = 0 : i64, scratch_operands = 5 : i64, tpu.core_type = #tpu.core_type<tc>, window_params = [{transform_indices = @transform_0, window_bounds = array<i64: 8, 64>}, {pipeline_mode = #tpu.pipeline_mode<synchronous>, transform_indices = @transform_1, window_bounds = array<i64: 64, 128>}, {pipeline_mode = #tpu.pipeline_mode<synchronous>, transform_indices = @transform_2, window_bounds = array<i64: 1, 128>}, {pipeline_mode = #tpu.pipeline_mode<synchronous>, transform_indices = @transform_3, window_bounds = array<i64: 1, 128>}, {pipeline_mode = #tpu.pipeline_mode<synchronous>, transform_indices = @transform_4, window_bounds = array<i64: 128, 128>}, {pipeline_mode = #tpu.pipeline_mode<synchronous>, transform_indices = @transform_5, window_bounds = array<i64: 1, 128>}, {transform_indices = @transform_6, window_bounds = array<i64: 8, 128>}, {transform_indices = @transform_7, window_bounds = array<i64: 8, 128>}]} {
    %c8_i32 = arith.constant 8 : i32
    %0 = arith.muli %arg1, %c8_i32 : i32
    %1 = tpu.assume_multiple %0, 8 : i32
    %c0_i32 = arith.constant 0 : i32
    %2 = arith.cmpi eq, %arg0, %c0_i32 : i32
    %3 = arith.extui %2 : i1 to i32
    %c0_i32_0 = arith.constant 0 : i32
    %4 = arith.cmpi ne, %3, %c0_i32_0 : i32
    scf.if %4 {
      %c0 = arith.constant 0 : index
      %c0_2 = arith.constant 0 : index
      %8 = vector.load %arg2[%c0, %c0_2] : memref<8x64xf32, #tpu.memory_space<vmem>>, vector<8x64xf32>
      %c0_3 = arith.constant 0 : index
      %c0_4 = arith.constant 0 : index
      %9 = vector.load %arg3[%c0_3, %c0_4] : memref<64x128xf32, #tpu.memory_space<vmem>>, vector<64x128xf32>
      %cst = arith.constant dense<0.000000e+00> : vector<8x128xf32>
      %10 = tpu.matmul %8, %9, %cst {dimension_numbers = #tpu.dot_dimension_numbers<[1], [0], [0], [1], [0, 0, 1, 1], [], []>} : vector<8x64xf32>, vector<64x128xf32>, vector<8x128xf32> -> vector<8x128xf32>
      %11 = arith.index_cast %1 : i32 to index
      %c0_5 = arith.constant 0 : index
      %12 = vector.load %arg10[%11, %c0_5] : memref<8x128xf32, #tpu.memory_space<vmem>>, vector<8x128xf32>
      tpu.vector_store %arg10[%11, %c0_5], %10 {strides = array<i32>} : memref<8x128xf32, #tpu.memory_space<vmem>>, vector<8x128xf32>,
      %c0_i32_6 = arith.constant 0 : i32
      %13 = arith.cmpi eq, %arg1, %c0_i32_6 : i32
      %14 = arith.extui %13 : i1 to i32
      %c0_i32_7 = arith.constant 0 : i32
      %15 = arith.cmpi ne, %14, %c0_i32_7 : i32
      scf.if %15 {
        %cst_20 = arith.constant 0.000000e+00 : f32
        %30 = vector.broadcast %cst_20 : f32 to vector<1x128xf32>
        %c0_21 = arith.constant 0 : index
        %c0_22 = arith.constant 0 : index
        %31 = vector.load %arg11[%c0_21, %c0_22] : memref<1x128xf32, #tpu.memory_space<vmem>>, vector<1x128xf32>
        tpu.vector_store %arg11[%c0_21, %c0_22], %30 {strides = array<i32>} : memref<1x128xf32, #tpu.memory_space<vmem>>, vector<1x128xf32>,
        %cst_23 = arith.constant 0.000000e+00 : f32
        %32 = vector.broadcast %cst_23 : f32 to vector<1x128xf32>
        %c0_24 = arith.constant 0 : index
        %c0_25 = arith.constant 0 : index
        %33 = vector.load %arg12[%c0_24, %c0_25] : memref<1x128xf32, #tpu.memory_space<vmem>>, vector<1x128xf32>
        tpu.vector_store %arg12[%c0_24, %c0_25], %32 {strides = array<i32>} : memref<1x128xf32, #tpu.memory_space<vmem>>, vector<1x128xf32>,
      } else {
      }
      %c0_8 = arith.constant 0 : index
      %c0_9 = arith.constant 0 : index
      %16 = vector.load %arg11[%c0_8, %c0_9] : memref<1x128xf32, #tpu.memory_space<vmem>>, vector<1x128xf32>
      %cst_10 = arith.constant dense<0.000000e+00> : vector<128xf32>
      %17 = vector.multi_reduction <add>, %10, %cst_10 [0] : vector<8x128xf32> to vector<128xf32>
      %18 = vector.shape_cast %17 : vector<128xf32> to vector<1x128xf32>
      %19 = arith.addf %16, %18 : vector<1x128xf32>
      %c0_11 = arith.constant 0 : index
      %c0_12 = arith.constant 0 : index
      %20 = vector.load %arg11[%c0_11, %c0_12] : memref<1x128xf32, #tpu.memory_space<vmem>>, vector<1x128xf32>
      tpu.vector_store %arg11[%c0_11, %c0_12], %19 {strides = array<i32>} : memref<1x128xf32, #tpu.memory_space<vmem>>, vector<1x128xf32>,
      %c0_13 = arith.constant 0 : index
      %c0_14 = arith.constant 0 : index
      %21 = vector.load %arg12[%c0_13, %c0_14] : memref<1x128xf32, #tpu.memory_space<vmem>>, vector<1x128xf32>
      %22 = arith.mulf %10, %10 : vector<8x128xf32>
      %cst_15 = arith.constant dense<0.000000e+00> : vector<128xf32>
      %23 = vector.multi_reduction <add>, %22, %cst_15 [0] : vector<8x128xf32> to vector<128xf32>
      %24 = vector.shape_cast %23 : vector<128xf32> to vector<1x128xf32>
      %25 = arith.addf %21, %24 : vector<1x128xf32>
      %c0_16 = arith.constant 0 : index
      %c0_17 = arith.constant 0 : index
      %26 = vector.load %arg12[%c0_16, %c0_17] : memref<1x128xf32, #tpu.memory_space<vmem>>, vector<1x128xf32>
      tpu.vector_store %arg12[%c0_16, %c0_17], %25 {strides = array<i32>} : memref<1x128xf32, #tpu.memory_space<vmem>>, vector<1x128xf32>,
      %c0_i32_18 = arith.constant 0 : i32
      %27 = arith.cmpi eq, %arg1, %c0_i32_18 : i32
      %28 = arith.extui %27 : i1 to i32
      %c0_i32_19 = arith.constant 0 : i32
      %29 = arith.cmpi ne, %28, %c0_i32_19 : i32
      scf.if %29 {
        %c0_20 = arith.constant 0 : index
        %c0_21 = arith.constant 0 : index
        %30 = vector.load %arg11[%c0_20, %c0_21] : memref<1x128xf32, #tpu.memory_space<vmem>>, vector<1x128xf32>
        %cst_22 = arith.constant 1.250000e-01 : f32
        %31 = vector.broadcast %cst_22 : f32 to vector<1x128xf32>
        %32 = arith.mulf %30, %31 : vector<1x128xf32>
        %c0_23 = arith.constant 0 : index
        %c0_24 = arith.constant 0 : index
        %33 = vector.load %arg12[%c0_23, %c0_24] : memref<1x128xf32, #tpu.memory_space<vmem>>, vector<1x128xf32>
        %cst_25 = arith.constant 1.250000e-01 : f32
        %34 = vector.broadcast %cst_25 : f32 to vector<1x128xf32>
        %35 = arith.mulf %33, %34 : vector<1x128xf32>
        %36 = arith.mulf %32, %32 : vector<1x128xf32>
        %37 = arith.subf %35, %36 : vector<1x128xf32>
        %cst_26 = arith.constant 0.000000e+00 : f32
        %38 = vector.broadcast %cst_26 : f32 to vector<1x128xf32>
        %39 = arith.maximumf %37, %38 : vector<1x128xf32>
        %c0_27 = arith.constant 0 : index
        %c0_28 = arith.constant 0 : index
        %40 = vector.load %arg4[%c0_27, %c0_28] : memref<1x128xf32, #tpu.memory_space<vmem>>, vector<1x128xf32>
        %cst_29 = arith.constant 9.99999974E-6 : f32
        %41 = vector.broadcast %cst_29 : f32 to vector<1x128xf32>
        %42 = arith.addf %39, %41 : vector<1x128xf32>
        %43 = math.rsqrt %42 : vector<1x128xf32>
        %44 = arith.mulf %40, %43 : vector<1x128xf32>
        %c0_30 = arith.constant 0 : index
        %c0_31 = arith.constant 0 : index
        %45 = vector.load %arg13[%c0_30, %c0_31] : memref<1x128xf32, #tpu.memory_space<vmem>>, vector<1x128xf32>
        tpu.vector_store %arg13[%c0_30, %c0_31], %44 {strides = array<i32>} : memref<1x128xf32, #tpu.memory_space<vmem>>, vector<1x128xf32>,
        %c0_32 = arith.constant 0 : index
        %c0_33 = arith.constant 0 : index
        %46 = vector.load %arg5[%c0_32, %c0_33] : memref<1x128xf32, #tpu.memory_space<vmem>>, vector<1x128xf32>
        %47 = arith.mulf %32, %44 : vector<1x128xf32>
        %48 = arith.subf %46, %47 : vector<1x128xf32>
        %c0_34 = arith.constant 0 : index
        %c0_35 = arith.constant 0 : index
        %49 = vector.load %arg14[%c0_34, %c0_35] : memref<1x128xf32, #tpu.memory_space<vmem>>, vector<1x128xf32>
        tpu.vector_store %arg14[%c0_34, %c0_35], %48 {strides = array<i32>} : memref<1x128xf32, #tpu.memory_space<vmem>>, vector<1x128xf32>,
      } else {
      }
    } else {
    }
    %c1_i32 = arith.constant 1 : i32
    %5 = arith.cmpi eq, %arg0, %c1_i32 : i32
    %6 = arith.extui %5 : i1 to i32
    %c0_i32_1 = arith.constant 0 : i32
    %7 = arith.cmpi ne, %6, %c0_i32_1 : i32
    scf.if %7 {
      %8 = arith.index_cast %1 : i32 to index
      %c0 = arith.constant 0 : index
      %9 = vector.load %arg10[%8, %c0] : memref<8x128xf32, #tpu.memory_space<vmem>>, vector<8x128xf32>
      %c0_2 = arith.constant 0 : index
      %c0_3 = arith.constant 0 : index
      %10 = vector.load %arg13[%c0_2, %c0_3] : memref<1x128xf32, #tpu.memory_space<vmem>>, vector<1x128xf32>
      %11 = vector.broadcast %10 : vector<1x128xf32> to vector<8x128xf32>
      %12 = arith.mulf %9, %11 : vector<8x128xf32>
      %c0_4 = arith.constant 0 : index
      %c0_5 = arith.constant 0 : index
      %13 = vector.load %arg14[%c0_4, %c0_5] : memref<1x128xf32, #tpu.memory_space<vmem>>, vector<1x128xf32>
      %14 = vector.broadcast %13 : vector<1x128xf32> to vector<8x128xf32>
      %15 = arith.addf %12, %14 : vector<8x128xf32>
      %cst = arith.constant 0.000000e+00 : f32
      %16 = vector.broadcast %cst : f32 to vector<8x128xf32>
      %17 = arith.maximumf %15, %16 : vector<8x128xf32>
      %18 = math.absf %15 : vector<8x128xf32>
      %cst_6 = arith.constant 0.000000e+00 : f32
      %19 = vector.broadcast %cst_6 : f32 to vector<8x128xf32>
      %20 = arith.subf %19, %18 : vector<8x128xf32>
      %21 = math.exp %20 : vector<8x128xf32>
      %22 = math.log1p %21 : vector<8x128xf32>
      %23 = arith.addf %17, %22 : vector<8x128xf32>
      %c0_7 = arith.constant 0 : index
      %c0_8 = arith.constant 0 : index
      %24 = vector.load %arg9[%c0_7, %c0_8] : memref<8x128xf32, #tpu.memory_space<vmem>>, vector<8x128xf32>
      tpu.vector_store %arg9[%c0_7, %c0_8], %23 {strides = array<i32>} : memref<8x128xf32, #tpu.memory_space<vmem>>, vector<8x128xf32>,
      %c0_9 = arith.constant 0 : index
      %c0_10 = arith.constant 0 : index
      %25 = vector.load %arg6[%c0_9, %c0_10] : memref<128x128xf32, #tpu.memory_space<vmem>>, vector<128x128xf32>
      %cst_11 = arith.constant dense<0.000000e+00> : vector<8x128xf32>
      %26 = tpu.matmul %23, %25, %cst_11 {dimension_numbers = #tpu.dot_dimension_numbers<[1], [0], [0], [1], [0, 0, 1, 1], [], []>} : vector<8x128xf32>, vector<128x128xf32>, vector<8x128xf32> -> vector<8x128xf32>
      %c0_12 = arith.constant 0 : index
      %c0_13 = arith.constant 0 : index
      %27 = vector.load %arg7[%c0_12, %c0_13] : memref<1x128xf32, #tpu.memory_space<vmem>>, vector<1x128xf32>
      %28 = vector.broadcast %27 : vector<1x128xf32> to vector<8x128xf32>
      %29 = arith.addf %26, %28 : vector<8x128xf32>
      %c0_14 = arith.constant 0 : index
      %c0_15 = arith.constant 0 : index
      %30 = vector.load %arg8[%c0_14, %c0_15] : memref<8x128xf32, #tpu.memory_space<vmem>>, vector<8x128xf32>
      tpu.vector_store %arg8[%c0_14, %c0_15], %29 {strides = array<i32>} : memref<8x128xf32, #tpu.memory_space<vmem>>, vector<8x128xf32>,
    } else {
    }
    return
  }
  func.func @transform_0(%arg0: i32, %arg1: i32) -> (i32, i32) {
    %c1_i32 = arith.constant 1 : i32
    %0 = arith.subi %c1_i32, %arg0 : i32
    %1 = arith.muli %arg1, %0 : i32
    %c0_i32 = arith.constant 0 : i32
    %c0_i32_0 = arith.constant 0 : i32
    return %1, %c0_i32 : i32, i32
  }
  func.func @transform_1(%arg0: i32, %arg1: i32) -> (i32, i32) {
    %c0_i32 = arith.constant 0 : i32
    %c0_i32_0 = arith.constant 0 : i32
    %c0_i32_1 = arith.constant 0 : i32
    return %c0_i32, %c0_i32_0 : i32, i32
  }
  func.func @transform_2(%arg0: i32, %arg1: i32) -> (i32, i32) {
    %c0_i32 = arith.constant 0 : i32
    %c0_i32_0 = arith.constant 0 : i32
    %c0_i32_1 = arith.constant 0 : i32
    return %c0_i32, %c0_i32_0 : i32, i32
  }
  func.func @transform_3(%arg0: i32, %arg1: i32) -> (i32, i32) {
    %c0_i32 = arith.constant 0 : i32
    %c0_i32_0 = arith.constant 0 : i32
    %c0_i32_1 = arith.constant 0 : i32
    return %c0_i32, %c0_i32_0 : i32, i32
  }
  func.func @transform_4(%arg0: i32, %arg1: i32) -> (i32, i32) {
    %c0_i32 = arith.constant 0 : i32
    %c0_i32_0 = arith.constant 0 : i32
    %c0_i32_1 = arith.constant 0 : i32
    return %c0_i32, %c0_i32_0 : i32, i32
  }
  func.func @transform_5(%arg0: i32, %arg1: i32) -> (i32, i32) {
    %c0_i32 = arith.constant 0 : i32
    %c0_i32_0 = arith.constant 0 : i32
    %c0_i32_1 = arith.constant 0 : i32
    return %c0_i32, %c0_i32_0 : i32, i32
  }
  func.func @transform_6(%arg0: i32, %arg1: i32) -> (i32, i32) {
    %0 = arith.muli %arg1, %arg0 : i32
    %c0_i32 = arith.constant 0 : i32
    %c0_i32_0 = arith.constant 0 : i32
    return %0, %c0_i32 : i32, i32
  }
  func.func @transform_7(%arg0: i32, %arg1: i32) -> (i32, i32) {
    %0 = arith.muli %arg1, %arg0 : i32
    %c0_i32 = arith.constant 0 : i32
    %c0_i32_0 = arith.constant 0 : i32
    return %0, %c0_i32 : i32, i32
  }
}

</mosaic_0001>

<bundles_post_ra>
// kernel: two_layer_nn.1
= control target key start
LH: loop header
LB: loop body
LE: loop exit
PB: predicated region body
PF: predicated region fallthrough
CT: control target
= control target key end

     0   :  { %13 = vsyncpa [#allocation8], 0  ;;  %s954_s0 = inlined_call_operand.vmem [shape: f32[8,64], index: 0, kind: input, shape index: {}]   ;;  %s955_s1 = inlined_call_operand.vmem [shape: f32[64,128], index: 1, kind: input, shape index: {}]   ;;  %s956_s2 = inlined_call_operand.vmem [shape: f32[1,128], index: 2, kind: input, shape index: {}]   ;;  %s957_s3 = inlined_call_operand.vmem [shape: f32[1,128], index: 3, kind: input, shape index: {}]   ;;  %s958_s4 = inlined_call_operand.vmem [shape: f32[128,128], index: 4, kind: input, shape index: {}]   ;;  %s959_s5 = inlined_call_operand.vmem [shape: f32[1,128], index: 5, kind: input, shape index: {}]   ;;  %s960_s6 = inlined_call_operand.hbm [shape: f32[8,128], index: 6, kind: output, shape index: {0}]   ;;  %s961_s7 = inlined_call_operand.hbm [shape: f32[8,128], index: 7, kind: output, shape index: {1}]  }
   0x1   :  { %15 = vsyncpa [#allocation8 + $0x1], 0 }
   0x2   :  { %16 = vsyncpa [#allocation10], 0 }
   0x3   :  { %18 = vsyncpa [#allocation10 + $0x1], 0  ;;  %s826_s24 = smov 0   ;;  %s828_s25 = smov 0  }
   0x4   :  { %s830_s26 = smov 0  }
   0x5 LB: > { %s624_s27 = sadd.s32 4294967295, %s781_s26   ;;  %s625_s28 = sadd.s32 4294967294, %s781_s26   ;;  %s781_s26 = sphi %s830_s26, %s24_s26   ;;  %s777_s25 = sphi %s828_s25, %s963_s25   ;;  %s773_s24 = sphi %s826_s24, %s962_s24  }
   0x6   : > { %s36_s29 = sadd.s32 1, %s777_s25  ;;  %p629_p0 = scmp.ge.s32.totalorder %s781_s26, 1 }
   0x7   : > { %p38_p1 = scmp.ge.s32.totalorder %s36_s29, 2  ;;  %p269_p2 = scmp.lt.s32.totalorder %s781_s26, 3 }
   0x9   : > { %s965_s29 = smov (%p38_p1, %s36_s29), 0  ;;  %p270_p3 = pnand %p629_p0, %p269_p2 }
   0xa   : > { %p630_p4 = scmp.ne.s32.totalorder (!%p270_p3), %s773_s24, 0 }
   0xb   : > { %273 = sbr.rel (%p270_p3) target bundleno = 396 (0x18c), region = 44 }
  0x10   : > { %321 = sbr.rel (%p630_p4) target bundleno = 220 (0xdc), region = 48 }
  0x15   : > { %v330_v0 = vld [vmem:[%s955_s1 + $0x38] sm:$0xff]  ;;  %v329_v1 = vld [vmem:[%s955_s1 + $0x30] sm:$0xff]  ;;  %v328_v2 = vld [vmem:[%s955_s1 + $0x28] sm:$0xff]  ;;  %vm331_vm0 = vcmask 523264   ;;  %v783_v9 = vmov 0.0  }
  0x16   : > { %343 = vmatpush.msra.mxu0 %v330_v0  ;;  %v327_v3 = vld [vmem:[%s955_s1 + $0x20] sm:$0xff]  ;;  %v326_v4 = vld [vmem:[%s955_s1 + $0x18] sm:$0xff]  ;;  %v325_v5 = vld [vmem:[%s955_s1 + $0x10] sm:$0xff]  ;;  %361 = vst [vmem:[#allocation3] sm:$0x1] %v783_v9 }
  0x17   : > { %v324_v6 = vld [vmem:[%s955_s1 + $0x8] sm:$0xff]  ;;  %v323_v7 = vld [vmem:[%s955_s1] sm:$0xff]  ;;  %362 = vst [vmem:[#allocation4] sm:$0x1] %v783_v9 }
  0x18   : > { %344 = vmatpush.msra.mxu0 %v329_v1  ;;  %v322_v8 = vld [vmem:[%s954_s0] sm:$0xff] }
  0x19   : > { %v392_v41 = vld [vmem:[%s956_s2] sm:$0x1] }
  0x1a   : > { %345 = vmatpush.msra.mxu0 %v328_v2  ;;  %v406_v45 = vld [vmem:[%s957_s3] sm:$0x1] }
  0x1c   : > { %346 = vmatpush.msra.mxu0 %v327_v3 }
  0x1d   : > { %v363_v21 = vld [vmem:[#allocation3] sm:$0x1] }
  0x1e   : > { %347 = vmatpush.msra.mxu0 %v326_v4  ;;  %v372_v24 = vld [vmem:[#allocation4] sm:$0x1] }
  0x20   : > { %348 = vmatpush.msra.mxu0 %v325_v5 }
  0x22   : > { %349 = vmatpush.msra.mxu0 %v324_v6 }
  0x24   : > { %350 = vmatpush.msra.mxu0 %v323_v7 }
  0x25   : > { %631 = vmatmul.msk.f32.vlgmr.msra.gmra.mxu0 %vm331_vm0, %v322_v8 }
  0xa2   : > { %v352_v10 = vpop.f32.mrf.mxu0 }
  0xa3   : > { %356 = vst [vmem:[#allocation2] sm:$0xff] %v352_v10  ;;  %v364_v11 = vrot.slane %v352_v10, 4  ;;  %v373_v12 = vmul.f32 %v352_v10, %v352_v10 }
  0xa5   : > { %v365_v13 = vadd.f32 %v364_v11, %v352_v10  ;;  %v374_v14 = vrot.slane %v373_v12, 4 }
  0xa7   : > { %v366_v15 = vrot.slane %v365_v13, 2  ;;  %v375_v16 = vadd.f32 %v374_v14, %v373_v12 }
  0xa9   : > { %v367_v17 = vadd.f32 %v366_v15, %v365_v13  ;;  %v376_v18 = vrot.slane %v375_v16, 2 }
  0xab   : > { %v368_v19 = vrot.slane %v367_v17, 1  ;;  %v377_v20 = vadd.f32 %v376_v18, %v375_v16 }
  0xad   : > { %v369_v22 = vadd.f32 %v368_v19, %v367_v17  ;;  %v378_v23 = vrot.slane %v377_v20, 1 }
  0xaf   : > { %v370_v25 = vadd.f32 %v369_v22, %v363_v21  ;;  %v379_v26 = vadd.f32 %v378_v23, %v377_v20 }
  0xb1   : > { %371 = vst [vmem:[#allocation3] sm:$0x1] %v370_v25  ;;  %v380_v27 = vadd.f32 %v379_v26, %v372_v24 }
  0xb3   : > { %381 = vst [vmem:[#allocation4] sm:$0x1] %v380_v27 }
  0xb8   : > { %v385_v28 = vld [vmem:[#allocation3] sm:$0x1] }
  0xb9   : > { %v386_v29 = vmul.f32 0.125, %v385_v28 }
  0xba   : > { %v387_v30 = vld [vmem:[#allocation4] sm:$0x1] }
  0xbb   : > { %v388_v31 = vmul.f32 0.125, %v387_v30  ;;  %v389_v32 = vmul.f32 %v386_v29, %v386_v29 }
  0xbd   : > { %v390_v33 = vsub.f32 %v388_v31, %v389_v32 }
  0xbf   : > { %v391_v34 = vmax.f32 %v390_v33, 0.0 }
  0xc1   : > { %v393_v35 = vadd.f32 1e-05, %v391_v34 }
  0xc3   : > { %686 = vrsqrt.f32 %v393_v35  ;;  %vm400_vm2 = vweird.f32 %v393_v35 }
  0xc9   : > { %v687_v36 = vpop.eup %686 }
  0xca   : > { %v395_v37 = vmul.f32 %v687_v36, %v393_v35  ;;  %vm401_vm1 = vweird.f32 %v687_v36 }
  0xcb   : > { %vm402_vm3 = vmor %vm400_vm2, %vm401_vm1 }
  0xcc   : > { %v396_v38 = vmul.f32 %v687_v36, %v395_v37 }
  0xce   : > { %v397_v39 = vmul.f32 0.5, %v396_v38 }
  0xd0   : > { %v398_v40 = vsub.f32 1.5, %v397_v39 }
  0xd2   : > { %v399_v42 = vmul.f32 %v687_v36, %v398_v40 }
  0xd4   : > { %v403_v43 = vsel %vm402_vm3, %v687_v36, %v399_v42 }
  0xd5   : > { %v404_v44 = vmul.f32 %v403_v43, %v392_v41 }
  0xd7   : > { %405 = vst [vmem:[#allocation5] sm:$0x1] %v404_v44  ;;  %v407_v46 = vmul.f32 %v404_v44, %v386_v29 }
  0xd9   : > { %v408_v47 = vsub.f32 %v406_v45, %v407_v46 }
  0xdb   : > { %409 = vst [vmem:[#allocation6] sm:$0x1] %v408_v47 }
  0xdc PF: > { %p632_p5 = scmp.ne.s32.totalorder %s773_s24, 1 }
  0xde   : > { %413 = sbr.rel (%p632_p5) target bundleno = 390 (0x186), region = 60 }
  0xe3   : > { %v457_v48 = vld [vmem:[%s958_s4 + $0x78] sm:$0xff]  ;;  %v456_v49 = vld [vmem:[%s958_s4 + $0x70] sm:$0xff]  ;;  %v455_v50 = vld [vmem:[%s958_s4 + $0x68] sm:$0xff] }
  0xe4   : > { %462 = vmatpush.msra.mxu0 %v457_v48  ;;  %v454_v51 = vld [vmem:[%s958_s4 + $0x60] sm:$0xff]  ;;  %v453_v52 = vld [vmem:[%s958_s4 + $0x58] sm:$0xff]  ;;  %v688_v54 = vld [vmem:[#allocation5] ss:$0 sm:$0xff] }
  0xe5   : > { %v415_v53 = vld [vmem:[#allocation2] sm:$0xff]  ;;  %v689_v55 = vld [vmem:[#allocation6] ss:$0 sm:$0xff]  ;;  %v452_v56 = vld [vmem:[%s958_s4 + $0x50] sm:$0xff] }
  0xe6   : > { %463 = vmatpush.msra.mxu0 %v456_v49  ;;  %v420_v57 = vmul.f32 %v688_v54, %v415_v53  ;;  %v451_v58 = vld [vmem:[%s958_s4 + $0x48] sm:$0xff]  ;;  %v450_v60 = vld [vmem:[%s958_s4 + $0x40] sm:$0xff]  ;;  %v449_v62 = vld [vmem:[%s958_s4 + $0x38] sm:$0xff] }
  0xe7   : > { %v448_v0 = vld [vmem:[%s958_s4 + $0x30] sm:$0xff]  ;;  %v447_v2 = vld [vmem:[%s958_s4 + $0x28] sm:$0xff]  ;;  %v446_v3 = vld [vmem:[%s958_s4 + $0x20] sm:$0xff] }
  0xe8   : > { %464 = vmatpush.msra.mxu0 %v455_v50  ;;  %v425_v59 = vadd.f32 %v689_v55, %v420_v57  ;;  %v445_v4 = vld [vmem:[%s958_s4 + $0x18] sm:$0xff]  ;;  %v444_v6 = vld [vmem:[%s958_s4 + $0x10] sm:$0xff]  ;;  %v443_v9 = vld [vmem:[%s958_s4 + $0x8] sm:$0xff] }
  0xe9   : > { %v442_v10 = vld [vmem:[%s958_s4] sm:$0xff] }
  0xea   : > { %465 = vmatpush.msra.mxu0 %v454_v51  ;;  %v427_v61 = vand.u32 2147483647, %v425_v59  ;;  %v426_v15 = vmax.f32 %v425_v59, 0.0  ;;  %v690_v19 = vld [vmem:[%s959_s5] ss:$0 sm:$0xff] }
  0xec   : > { %466 = vmatpush.msra.mxu0 %v453_v52  ;;  %v428_v63 = vsub.f32 0.0, %v427_v61 }
  0xee   : > { %467 = vmatpush.msra.mxu0 %v452_v56  ;;  %v429_v1 = vmul.f32 1.442695, %v428_v63 }
  0xf0   : > { %468 = vmatpush.msra.mxu0 %v451_v58  ;;  %691 = vpow2.f32 %v429_v1 }
  0xf2   : > { %469 = vmatpush.msra.mxu0 %v450_v60 }
  0xf4   : > { %470 = vmatpush.msra.mxu0 %v449_v62 }
  0xf6   : > { %471 = vmatpush.msra.mxu0 %v448_v0  ;;  %v692_v5 = vpop.eup %691 }
  0xf7   : > { %v431_v7 = vadd.f32 1.0, %v692_v5  ;;  %v434_v8 = vmul.f32 -0.5, %v692_v5  ;;  %v437_v12 = vand.u32 2147483647, %v692_v5 }
  0xf8   : > { %472 = vmatpush.msra.mxu0 %v447_v2 }
  0xf9   : > { %693 = vlog2.f32 %v431_v7  ;;  %v435_v11 = vadd.f32 1.0, %v434_v8  ;;  %vm438_vm4 = vcmp.lt.f32.partialorder %v437_v12, 0.0004427343 }
  0xfa   : > { %473 = vmatpush.msra.mxu0 %v446_v3 }
  0xfb   : > { %v436_v13 = vmul.f32 %v692_v5, %v435_v11 }
  0xfc   : > { %474 = vmatpush.msra.mxu0 %v445_v4 }
  0xfe   : > { %475 = vmatpush.msra.mxu0 %v444_v6 }
  0xff   : > { %v694_v14 = vpop.eup %693 }
 0x100   : > { %476 = vmatpush.msra.mxu0 %v443_v9  ;;  %v433_v16 = vmul.f32 0.6931472, %v694_v14 }
 0x102   : > { %477 = vmatpush.msra.mxu0 %v442_v10  ;;  %v439_v17 = vsel %vm438_vm4, %v436_v13, %v433_v16 }
 0x103   : > { %v440_v18 = vadd.f32 %v439_v17, %v426_v15 }
 0x105   : > { %441 = vst [vmem:[#allocation9] sm:$0xff] %v440_v18  ;;  %478 = vmatmul.f32.vlgmr.msra.gmra.mxu0 %v440_v18 }
 0x182   : > { %v479_v20 = vpop.f32.mrf.mxu0 }
 0x183   : > { %v480_v21 = vadd.f32 %v690_v19, %v479_v20 }
 0x185   : > { %482 = vst [vmem:[#allocation7] sm:$0xff] %v480_v21 }
 0x186 PF: > { %p654_p6 = scmp.eq.s32.totalorder %s624_s27, 1  ;;  %s504_s12 = sshll.u32 %s960_s6, 4  ;;  %s505_s12 = int_to_ptr.hbm [resolvable:$true] %s504_s12 }
 0x187   : > { %s784_s13 = smov [#allocation7]   ;;  %s785_s15 = smov [#allocation9]  }
 0x188   : > { %s502_s14 = sshll.u32 %s784_s13, 4  ;;  %s517_s16 = sshll.u32 %s785_s15, 4  ;;  %s503_s14 = int_to_ptr.vmem [resolvable:$true] %s502_s14  ;;  %s518_s16 = int_to_ptr.vmem [resolvable:$true] %s517_s16 }
 0x189   : > { %640 = dma.vmem_to_hbm [thread:$0]  (%p654_p6), %s503_s14, 128, %s505_s12, [#allocation8]  }
 0x18a   : > { %s519_s19 = sshll.u32 %s961_s7, 4  ;;  %s520_s19 = int_to_ptr.hbm [resolvable:$true] %s519_s19 }
 0x18b   : > { %642 = dma.vmem_to_hbm [thread:$0]  (%p654_p6), %s518_s16, 128, %s520_s19, [#allocation10]  }
 0x18c PF: > { %p656_p7 = scmp.ge.s32.totalorder %s781_s26, 2  ;;  %p657_p8 = scmp.eq.s32.totalorder %s625_s28, 1 }
 0x18e   : > { %p648_p9 = pnand %p657_p8, %p656_p7 }
 0x190   : > { %p649_p10 = pneg %p648_p9 }
 0x192   : > { %764 = dma.done.wait (%p649_p10), [#allocation8], 128  }
 0x193   : > { %766 = vsyncadd (%p649_p10), [#allocation8], 4294967168 }
 0x194   : > { %768 = dma.done.wait (%p649_p10), [#allocation10], 128  }
 0x195   : > { %770 = vsyncadd (%p649_p10), [#allocation10], 4294967168  ;;  %s24_s26 = sadd.s32 1, %s781_s26   ;;  %s962_s24 = smov %s777_s25 }
 0x196   : > { %p21_p11 = scmp.ge.s32.totalorder %s24_s26, 4   ;;  %s963_s25 = smov %s965_s29 }
 0x198   :  { %23 = sbr.rel (!%p21_p11) target bundleno = 5 (0x5), region = 114 }
 0x19d   :  { %548 = vsyncpa [#allocation8], 1 }
 0x19e   :  { %550 = vsyncpa [#allocation8 + $0x1], 1 }
 0x19f   :  { %551 = vsyncpa [#allocation10], 1 }
 0x1a0   :  { %553 = vsyncpa [#allocation10 + $0x1], 1 }

</bundles_post_ra>
